<compile_context>
chip_gen: v5e
topology: v5e:2x2
jax: 0.10.0
libtpu: 0.0.40
codegen_flags: <defaults>
</compile_context>

<pallas_src>
import jax
import jax.numpy as jnp
from jax.experimental import pallas as pl
from jax.experimental.pallas import tpu as pltpu


def _round_up(v, m):
    return -(-v // m) * m


def _patch_embed_kernel(x_ref, w_ref, pos_ref, out_ref):
    # x_ref:   (Bt, C, N, P)  f32  -- x in native channel-major layout
    # w_ref:   (C, P, E)      bf16 -- weight[e, s2*C + c] rearranged to [c, s2, e]
    # pos_ref: (N + 1, E)     f32  -- row 0 = cls_token + positions[0],
    #                                 rows 1.. = positions[1:] + bias
    # out_ref: (Bt, N + 1, E) f32
    Bt, C, N, P = x_ref.shape

    pos = pos_ref[...]
    cls_row = pos[0:1, :]                         # (1, E)  batch-invariant
    pos_body = pos[1:, :]                         # (N, E)
    w_chans = [w_ref[c] for c in range(C)]        # hoist weight loads out of b-loop

    for b in range(Bt):                           # static unroll, Bt kept small
        acc = pos_body                            # start from positions+bias (f32)
        for c in range(C):
            xc = x_ref[b, c].astype(jnp.bfloat16)             # (N, P)
            acc = acc + jnp.dot(xc, w_chans[c],
                                preferred_element_type=jnp.float32)
        full = jnp.concatenate([cls_row, acc], axis=0)        # (N + 1, E)
        out_ref[b] = full.astype(out_ref.dtype)               # one dense store


def _pick_batch_tile(B, N, C):
    # ~512 output rows per grid step, bounded unroll (Bt*C matmuls), and >= 2
    # grid steps whenever possible (pipelining + v7x's two TensorCores).
    bt = max(1, min(B, max(1, 512 // max(N, 1)), max(1, 64 // max(C, 1)), 8))
    while bt > 1 and B % bt:
        bt -= 1
    if bt == B and B > 1:
        bt = max(d for d in range(1, B) if B % d == 0)
    return bt


def patch_embedding_linear(x, weight, bias, cls_token, positions, patch_size):
    """Forward pass of PatchEmbedding_Linear.

    x:         (B, C, H, W)   NCHW, W divisible by patch_size
    weight:    (E, P*C)       nn.Linear weight (out_features, in_features)
    bias:      (E,)
    cls_token: (1, 1, E)
    positions: (N + 1, E)     with N = H * (W // patch_size)
    returns    (B, N + 1, E)  float32
    """
    B, C, H, W = x.shape
    P = patch_size
    E = weight.shape[0]
    N = H * (W // P)

    # Free reshape (no transpose, no copy): x[b,c,h,wp*P+s2] -> x_r[b,c,n,s2].
    x_r = x.reshape(B, C, N, P).astype(jnp.float32)

    # Fold the einops (s2, c) feature ordering into the (tiny) weight instead
    # of transposing the activations: w_chan[c, s2, e] = weight[e, s2*C + c].
    w_chan = jnp.transpose(weight.reshape(E, P, C), (2, 1, 0)).astype(jnp.bfloat16)

    # Batch-invariant position table with cls token and bias fused in.
    cls_row = (cls_token.reshape(1, E) + positions[0:1]).astype(jnp.float32)
    pos_body = (positions[1:] + bias[None, :]).astype(jnp.float32)
    pos_full = jnp.concatenate([cls_row, pos_body], axis=0)       # (N + 1, E)

    Bt = _pick_batch_tile(B, N, C)
    grid = (B // Bt,)

    # Explicit VMEM budget from lane/sublane-padded tile sizes (double-buffered
    # inputs/outputs + invariants + headroom), capped for v7x's 64 MiB VMEM.
    x_blk = Bt * C * _round_up(N, 8) * 128 * 4        # P < 128 pads to a full lane tile
    o_blk = Bt * _round_up(N + 1, 8) * _round_up(E, 128) * 4
    w_b = C * _round_up(P, 16) * _round_up(E, 128) * 2
    p_b = _round_up(N + 1, 8) * _round_up(E, 128) * 4
    vmem_limit = 2 * 2 * (x_blk + o_blk) + 2 * (w_b + p_b) + (2 << 20)
    vmem_limit = int(min(max(vmem_limit, 16 << 20), 64 << 20))

    out = pl.pallas_call(
        _patch_embed_kernel,
        out_shape=jax.ShapeDtypeStruct((B, N + 1, E), jnp.float32),
        grid_spec=pltpu.PrefetchScalarGridSpec(
            num_scalar_prefetch=0,
            grid=grid,
            in_specs=[
                pl.BlockSpec((Bt, C, N, P), lambda i: (i, 0, 0, 0)),   # x tile
                pl.BlockSpec((C, P, E), lambda i: (0, 0, 0)),          # weight (C,P,E)
                pl.BlockSpec((N + 1, E), lambda i: (0, 0)),            # fused positions
            ],
            out_specs=pl.BlockSpec((Bt, N + 1, E), lambda i: (i, 0, 0)),
        ),
        compiler_params=pltpu.CompilerParams(
            dimension_semantics=("parallel",),
            vmem_limit_bytes=vmem_limit),
    )(x_r, w_chan, pos_full)
    return out


def _reference(x, weight, bias, cls_token, positions, patch_size):
    # Pure-JAX f32 reference mirroring the PyTorch forward.
    B, C, H, W = x.shape
    P = patch_size
    E = weight.shape[0]
    N = H * (W // P)
    patches = x.reshape(B, C, H, W // P, P)
    patches = jnp.transpose(patches, (0, 2, 3, 4, 1)).reshape(B, N, P * C)
    proj = patches @ weight.T + bias                          # (B, N, E)
    cls = jnp.broadcast_to(cls_token, (B, 1, E))
    return jnp.concatenate([cls, proj], axis=1) + positions


if __name__ == "__main__":
    # Small shapes consistent with the module:
    #   in_channels=4, patch_size=8, emb_size=32, seq_length=64, batch=2, H=1
    B, C, H, W = 2, 4, 1, 64
    P, E = 8, 32
    N = H * (W // P)

    key = jax.random.PRNGKey(0)
    k_x, k_w, k_b, k_cls, k_pos = jax.random.split(key, 5)

    x = jax.random.normal(k_x, (B, C, H, W), dtype=jnp.float32)
    weight = jax.random.normal(k_w, (E, P * C), dtype=jnp.float32) * 0.05
    bias = jax.random.normal(k_b, (E,), dtype=jnp.float32) * 0.05
    cls_token = jax.random.normal(k_cls, (1, 1, E), dtype=jnp.float32)
    positions = jax.random.normal(k_pos, (N + 1, E), dtype=jnp.float32)

    out = patch_embedding_linear(x, weight, bias, cls_token, positions, P)
    out = jax.block_until_ready(out)

    ref = _reference(x, weight, bias, cls_token, positions, P)
    assert out.shape == (B, N + 1, E)
    # bf16 matmul operands (f32 accumulation) => loosen tolerance vs f32 ref.
    assert jnp.allclose(out, ref, atol=2e-2, rtol=2e-2), float(
        jnp.max(jnp.abs(out - ref)))

    print("KERNEL_OK")
</pallas_src>

<mosaic_0001>
module attributes {stable_mosaic.version = 11 : i64} {
  func.func @_patch_embed_kernel(%arg0: i32, %arg1: memref<1x4x8x8xf32, #tpu.memory_space<vmem>>, %arg2: memref<4x8x32xbf16, #tpu.memory_space<vmem>>, %arg3: memref<9x32xf32, #tpu.memory_space<vmem>>, %arg4: memref<1x9x32xf32, #tpu.memory_space<vmem>>) attributes {dimension_semantics = [#tpu.dimension_semantics<parallel>], iteration_bounds = array<i64: 2>, scalar_prefetch = 0 : i64, scratch_operands = 0 : i64, tpu.core_type = #tpu.core_type<tc>, window_params = [{transform_indices = @transform_0, window_bounds = array<i64: 1, 4, 8, 8>}, {pipeline_mode = #tpu.pipeline_mode<synchronous>, transform_indices = @transform_1, window_bounds = array<i64: 4, 8, 32>}, {pipeline_mode = #tpu.pipeline_mode<synchronous>, transform_indices = @transform_2, window_bounds = array<i64: 9, 32>}, {transform_indices = @transform_3, window_bounds = array<i64: 1, 9, 32>}]} {
    %c0 = arith.constant 0 : index
    %c0_0 = arith.constant 0 : index
    %0 = vector.load %arg3[%c0, %c0_0] : memref<9x32xf32, #tpu.memory_space<vmem>>, vector<9x32xf32>
    %1 = vector.extract_strided_slice %0 {offsets = [0, 0], sizes = [1, 32], strides = [1, 1]} : vector<9x32xf32> to vector<1x32xf32>
    %2 = vector.extract_strided_slice %0 {offsets = [1, 0], sizes = [8, 32], strides = [1, 1]} : vector<9x32xf32> to vector<8x32xf32>
    %c0_1 = arith.constant 0 : index
    %c0_2 = arith.constant 0 : index
    %c0_3 = arith.constant 0 : index
    %3 = vector.load %arg2[%c0_1, %c0_2, %c0_3] : memref<4x8x32xbf16, #tpu.memory_space<vmem>>, vector<1x8x32xbf16>
    %4 = vector.shape_cast %3 : vector<1x8x32xbf16> to vector<8x32xbf16>
    %c1 = arith.constant 1 : index
    %c0_4 = arith.constant 0 : index
    %c0_5 = arith.constant 0 : index
    %5 = vector.load %arg2[%c1, %c0_4, %c0_5] : memref<4x8x32xbf16, #tpu.memory_space<vmem>>, vector<1x8x32xbf16>
    %6 = vector.shape_cast %5 : vector<1x8x32xbf16> to vector<8x32xbf16>
    %c2 = arith.constant 2 : index
    %c0_6 = arith.constant 0 : index
    %c0_7 = arith.constant 0 : index
    %7 = vector.load %arg2[%c2, %c0_6, %c0_7] : memref<4x8x32xbf16, #tpu.memory_space<vmem>>, vector<1x8x32xbf16>
    %8 = vector.shape_cast %7 : vector<1x8x32xbf16> to vector<8x32xbf16>
    %c3 = arith.constant 3 : index
    %c0_8 = arith.constant 0 : index
    %c0_9 = arith.constant 0 : index
    %9 = vector.load %arg2[%c3, %c0_8, %c0_9] : memref<4x8x32xbf16, #tpu.memory_space<vmem>>, vector<1x8x32xbf16>
    %10 = vector.shape_cast %9 : vector<1x8x32xbf16> to vector<8x32xbf16>
    %c0_10 = arith.constant 0 : index
    %c0_11 = arith.constant 0 : index
    %c0_12 = arith.constant 0 : index
    %c0_13 = arith.constant 0 : index
    %11 = vector.load %arg1[%c0_10, %c0_11, %c0_12, %c0_13] : memref<1x4x8x8xf32, #tpu.memory_space<vmem>>, vector<1x1x8x8xf32>
    %12 = vector.shape_cast %11 : vector<1x1x8x8xf32> to vector<8x8xf32>
    %13 = arith.truncf %12 : vector<8x8xf32> to vector<8x8xbf16>
    %cst = arith.constant dense<0.000000e+00> : vector<8x32xf32>
    %14 = tpu.matmul %13, %4, %cst {dimension_numbers = #tpu.dot_dimension_numbers<[1], [0], [0], [1], [0, 0, 1, 1], [], []>} : vector<8x8xbf16>, vector<8x32xbf16>, vector<8x32xf32> -> vector<8x32xf32>
    %15 = arith.addf %2, %14 : vector<8x32xf32>
    %c0_14 = arith.constant 0 : index
    %c1_15 = arith.constant 1 : index
    %c0_16 = arith.constant 0 : index
    %c0_17 = arith.constant 0 : index
    %16 = vector.load %arg1[%c0_14, %c1_15, %c0_16, %c0_17] : memref<1x4x8x8xf32, #tpu.memory_space<vmem>>, vector<1x1x8x8xf32>
    %17 = vector.shape_cast %16 : vector<1x1x8x8xf32> to vector<8x8xf32>
    %18 = arith.truncf %17 : vector<8x8xf32> to vector<8x8xbf16>
    %cst_18 = arith.constant dense<0.000000e+00> : vector<8x32xf32>
    %19 = tpu.matmul %18, %6, %cst_18 {dimension_numbers = #tpu.dot_dimension_numbers<[1], [0], [0], [1], [0, 0, 1, 1], [], []>} : vector<8x8xbf16>, vector<8x32xbf16>, vector<8x32xf32> -> vector<8x32xf32>
    %20 = arith.addf %15, %19 : vector<8x32xf32>
    %c0_19 = arith.constant 0 : index
    %c2_20 = arith.constant 2 : index
    %c0_21 = arith.constant 0 : index
    %c0_22 = arith.constant 0 : index
    %21 = vector.load %arg1[%c0_19, %c2_20, %c0_21, %c0_22] : memref<1x4x8x8xf32, #tpu.memory_space<vmem>>, vector<1x1x8x8xf32>
    %22 = vector.shape_cast %21 : vector<1x1x8x8xf32> to vector<8x8xf32>
    %23 = arith.truncf %22 : vector<8x8xf32> to vector<8x8xbf16>
    %cst_23 = arith.constant dense<0.000000e+00> : vector<8x32xf32>
    %24 = tpu.matmul %23, %8, %cst_23 {dimension_numbers = #tpu.dot_dimension_numbers<[1], [0], [0], [1], [0, 0, 1, 1], [], []>} : vector<8x8xbf16>, vector<8x32xbf16>, vector<8x32xf32> -> vector<8x32xf32>
    %25 = arith.addf %20, %24 : vector<8x32xf32>
    %c0_24 = arith.constant 0 : index
    %c3_25 = arith.constant 3 : index
    %c0_26 = arith.constant 0 : index
    %c0_27 = arith.constant 0 : index
    %26 = vector.load %arg1[%c0_24, %c3_25, %c0_26, %c0_27] : memref<1x4x8x8xf32, #tpu.memory_space<vmem>>, vector<1x1x8x8xf32>
    %27 = vector.shape_cast %26 : vector<1x1x8x8xf32> to vector<8x8xf32>
    %28 = arith.truncf %27 : vector<8x8xf32> to vector<8x8xbf16>
    %cst_28 = arith.constant dense<0.000000e+00> : vector<8x32xf32>
    %29 = tpu.matmul %28, %10, %cst_28 {dimension_numbers = #tpu.dot_dimension_numbers<[1], [0], [0], [1], [0, 0, 1, 1], [], []>} : vector<8x8xbf16>, vector<8x32xbf16>, vector<8x32xf32> -> vector<8x32xf32>
    %30 = arith.addf %25, %29 : vector<8x32xf32>
    %31 = tpu.concatenate %1, %30 in 0 : vector<1x32xf32>, vector<8x32xf32> -> vector<9x32xf32>
    %c0_29 = arith.constant 0 : index
    %c0_30 = arith.constant 0 : index
    %c0_31 = arith.constant 0 : index
    %32 = vector.load %arg4[%c0_29, %c0_30, %c0_31] : memref<1x9x32xf32, #tpu.memory_space<vmem>>, vector<1x9x32xf32>
    %33 = vector.shape_cast %32 : vector<1x9x32xf32> to vector<9x32xf32>
    %34 = vector.shape_cast %31 : vector<9x32xf32> to vector<1x9x32xf32>
    tpu.vector_store %arg4[%c0_29, %c0_30, %c0_31], %34 {strides = array<i32>} : memref<1x9x32xf32, #tpu.memory_space<vmem>>, vector<1x9x32xf32>,
    return
  }
  func.func @transform_0(%arg0: i32) -> (i32, i32, i32, i32) {
    %c0_i32 = arith.constant 0 : i32
    %c0_i32_0 = arith.constant 0 : i32
    %c0_i32_1 = arith.constant 0 : i32
    %c0_i32_2 = arith.constant 0 : i32
    return %arg0, %c0_i32, %c0_i32_0, %c0_i32_1 : i32, i32, i32, i32
  }
  func.func @transform_1(%arg0: i32) -> (i32, i32, i32) {
    %c0_i32 = arith.constant 0 : i32
    %c0_i32_0 = arith.constant 0 : i32
    %c0_i32_1 = arith.constant 0 : i32
    %c0_i32_2 = arith.constant 0 : i32
    return %c0_i32, %c0_i32_0, %c0_i32_1 : i32, i32, i32
  }
  func.func @transform_2(%arg0: i32) -> (i32, i32) {
    %c0_i32 = arith.constant 0 : i32
    %c0_i32_0 = arith.constant 0 : i32
    %c0_i32_1 = arith.constant 0 : i32
    return %c0_i32, %c0_i32_0 : i32, i32
  }
  func.func @transform_3(%arg0: i32) -> (i32, i32, i32) {
    %c0_i32 = arith.constant 0 : i32
    %c0_i32_0 = arith.constant 0 : i32
    %c0_i32_1 = arith.constant 0 : i32
    return %arg0, %c0_i32, %c0_i32_0 : i32, i32, i32
  }
}

</mosaic_0001>

<bundles_post_ra>
// kernel: tpu_custom_call.1
= control target key start
LH: loop header
LB: loop body
LE: loop exit
PB: predicated region body
PF: predicated region fallthrough
CT: control target
= control target key end

     0   :  { %8 = vsyncpa [#allocation3], 0  ;;  %s794_s0 = inlined_call_operand.hbm [shape: f32[2,4,8,8], index: 0, kind: input, shape index: {}]   ;;  %s795_s1 = inlined_call_operand.hbm [shape: bf16[4,8,32], index: 1, kind: input, shape index: {}]   ;;  %s796_s2 = inlined_call_operand.hbm [shape: f32[9,32], index: 2, kind: input, shape index: {}]   ;;  %s797_s3 = inlined_call_operand.vmem [shape: f32[2,9,32], index: 3, kind: output, shape index: {}]  }
   0x1   :  { %10 = vsyncpa [#allocation3 + $0x1], 0 }
   0x2   :  { %11 = vsyncpa [#allocation5], 0  ;;  %s682_s12 = smov 0   ;;  %s684_s13 = smov 0  }
   0x3   :  { %s686_s14 = smov 0   ;;  %s688_s15 = smov 0  }
   0x4 LB: > { %s701_s16 = sadd.s32 4294967295, %s654_s15   ;;  %p37_p0 = scmp.ne.s32.totalorder %s646_s13, %s642_s12  ;;  %s654_s15 = sphi %s688_s15, %s804_s15   ;;  %s650_s14 = sphi %s686_s14, %s803_s14   ;;  %s646_s13 = sphi %s684_s13, %s802_s13   ;;  %s642_s12 = sphi %s682_s12, %s801_s12  }
   0x5   : > { %p38_p1 = scmp.eq.s32.totalorder %s701_s16, 0  ;;  %p438_p2 = scmp.ge.s32.totalorder %s654_s15, 1 }
   0x6   : > { %p116_p3 = scmp.lt.s32.totalorder %s654_s15, 3  ;;  %s127_s20 = sshll.u32 %s795_s1, 4  ;;  %s128_s20 = int_to_ptr.hbm [resolvable:$true] %s127_s20 }
   0x7   : > { %p709_p4 = por %p38_p1, %p37_p0  ;;  %s656_s22 = smov [#allocation4]  }
   0x8   : > { %p716_p5 = pnand %p438_p2, %p116_p3  ;;  %s129_s23 = sshll.u32 %s656_s22, 4  ;;  %s130_s23 = int_to_ptr.vmem [resolvable:$true] %s129_s23 }
   0x9   : > { %s141_s26 = sshll.u32 %s796_s2, 4  ;;  %s657_s27 = smov 64   ;;  %s142_s26 = int_to_ptr.hbm [resolvable:$true] %s141_s26 }
   0xa   : > { %p472_p6 = pneg %p716_p5  ;;  %s658_s28 = smov 4  }
   0xb   : > { %s659_s29 = smov [#allocation6]   ;;  %s660_s4 = smov 128  }
   0xc   : > { %p473_p7 = pnand %p472_p6, %p38_p1  ;;  %s143_s30 = sshll.u32 %s659_s29, 4  ;;  %s144_s30 = int_to_ptr.vmem [resolvable:$true] %s143_s30 }
   0xd   : > { %s661_s5 = smov 8   ;;  %s731_s6 = sadd.s32 1, %s654_s15  }
   0xe   : > { %475 = dma.hbm_to_vmem [thread:$0]  (!%p473_p7), %s128_s20, 256, %s130_s23, [#allocation5], %s657_s27, %s657_s27, %s658_s28  }
   0xf   : > { %478 = dma.hbm_to_vmem [thread:$0]  (!%p473_p7), %s142_s26, 256, %s144_s30, [#allocation5], %s660_s4, %s660_s4, %s661_s5  }
  0x10   : > { %s21_s7 = ssub.s32 %s654_s15, %s731_s6  ;;  %s24_s8 = sadd.s32 1, %s650_s14 }
  0x11   : > { %p22_p8 = scmp.eq.s32.totalorder %s21_s7, 0  ;;  %p31_p9 = scmp.ne.s32.totalorder %s650_s14, %s646_s13 }
  0x12   : > { %p32_p10 = scmp.eq.s32.totalorder %s654_s15, 0  ;;  %s157_s10 = sand.u32 1, %s650_s14  }
  0x13   : > { %s740_s9 = scalar_select %p22_p8, %s650_s14, %s24_s8  }
  0x14   : > { %p33_p11 = por %p32_p10, %p31_p9  ;;  %s460_s11 = sshll.u32 %s654_s15, 5 }
  0x15   : > { %p485_p12 = scmp.lt.s32.totalorder %s654_s15, 2  ;;  %s442_s12 = sshll.u32 %s157_s10, 5 }
  0x16   : > { %s166_s20 = scalar_lea.hbm %s794_s0, %s460_s11  ;;  %s161_s23 = scalar_lea.vmem [#allocation2], %s442_s12 }
  0x17   : > { %s167_s22 = sshll.u32 %s166_s20, 4  ;;  %s169_s24 = sshll.u32 %s161_s23, 4  ;;  %s168_s22 = int_to_ptr.hbm [resolvable:$true] %s167_s22  ;;  %s170_s24 = int_to_ptr.vmem [resolvable:$true] %s169_s24 }
  0x18   : > { %p748_p13 = pnand %p485_p12, %p33_p11  ;;  %s158_s26 = scalar_lea.sflag [#allocation3], %s157_s10 }
  0x19   : > { %s586_s27 = sshra.s32 %s168_s22, 4  ;;  %s593_s30 = scalar_lea.hbm %s794_s0, 64  ;;  %s587_s27 = int_to_ptr.hbm [resolvable:$true] %s586_s27 }
  0x1a   : > { %s588_s28 = scalar_lea.hbm %s587_s27, 32  ;;  %p590_p2 = pneg %p748_p13 }
  0x1b   : > { %p589_p0 = scmp.ne.s32.totalorder %s587_s27, %s588_s28  ;;  %p594_p7 = scmp.lt.s32.totalorder %s587_s27, %s794_s0 }
  0x1c   : > { %p595_p8 = scmp.lt.s32.totalorder %s593_s30, %s588_s28 }
  0x1d   : > { %p591_p3 = pnand %p590_p2, %p589_p0 }
  0x1e   : > { %p596_p9 = por %p595_p8, %p594_p7 }
  0x1f   : > { %p592_p6 = pneg %p591_p3 }
  0x21   : > { %p597_p10 = pnand %p596_p9, %p592_p6 }
  0x23   : > { %600 = shalt.err (!%p597_p10)
}
  0x24   : > { %482 = dma.hbm_to_vmem [thread:$0]  (!%p748_p13), %s168_s22, 512, %s170_s24, %s158_s26, %s660_s4, %s660_s4, %s661_s5  }
  0x25   : > { %181 = sbr.rel (%p716_p5) target bundleno = 192 (0xc0), region = 32  ;;  %s183_s10 = sand.u32 (!%p716_p5), 1, %s646_s13  }
  0x26   : > { %s446_s11 = sshll.u32 (!%p716_p5), %s183_s10, 5  ;;  %s184_s12 = scalar_lea.sflag (!%p716_p5), [#allocation3], %s183_s10 }
  0x27   : > { %s187_s18 = scalar_lea.vmem (!%p716_p5), [#allocation2], %s446_s11 }
  0x2a   : > { %633 = dma.done.wait (%p709_p4), %s184_s12, 512  }
  0x2b   : > { %635 = vsyncadd (%p709_p4), %s184_s12, 4294966784 }
  0x2c   : > { %637 = dma.done.wait (%p38_p1), [#allocation5], 512  }
  0x2d   : > { %639 = vsyncadd (%p38_p1), [#allocation5], 4294966784  ;;  %vm242_vm0 = vcmask 1043456   ;;  %v229_v0 = vld [vmem:[#allocation4] sm:$0xf]  ;;  %vm238_vm1 = vcmask 64512  }
  0x2e   : > { %v231_v1 = vld [vmem:[#allocation4 + $0x4] sm:$0xf]  ;;  %v233_v2 = vld [vmem:[#allocation4 + $0x8] sm:$0xf]  ;;  %v244_v3 = vsel %vm242_vm0, %v229_v0, 0  ;;  %v454_v11 = vld [vmem:[%s187_s18 + $0x10] sm:$0xff] }
  0x2f   : > { %v271_v4 = vsel %vm242_vm0, %v231_v1, 0  ;;  %v298_v5 = vsel %vm242_vm0, %v233_v2, 0  ;;  %v235_v6 = vld [vmem:[#allocation4 + $0xc] sm:$0xf]  ;;  %v236_v7 = vld [vmem:[%s187_s18] sm:$0xff]  ;;  %253 = vmatpush.bf16.msra.mxu0 %v244_v3  ;;  %v456_v12 = vld [vmem:[%s187_s18 + $0x18] sm:$0xff]  ;;  %v293_v14 = vpack.c.bf16 %v454_v11, %v454_v11 }
  0x30   : > { %280 = vmatpush.bf16.msra.mxu1 %v271_v4  ;;  %v325_v8 = vsel %vm242_vm0, %v235_v6, 0  ;;  %v237_v9 = vpack.c.bf16 %v236_v7, %v236_v7  ;;  %v452_v10 = vld [vmem:[%s187_s18 + $0x8] sm:$0xff]  ;;  %307 = vmatpush.bf16.msra.mxu2 %v298_v5  ;;  %v320_v15 = vpack.c.bf16 %v456_v12, %v456_v12  ;;  %v227_v16 = vld [vmem:[#allocation6] sm:$0xff]  ;;  %v228_v17 = vld [vmem:[#allocation6 + $0x8] sm:$0x1]  ;;  %p221_p1 = scmp.lt.s32.totalorder %s701_s16, 1 }
  0x31   : > { %334 = vmatpush.bf16.msra.mxu3 %v325_v8  ;;  %v266_v13 = vpack.c.bf16 %v452_v10, %v452_v10  ;;  %vm345_vm2 = vcmask 1040384   ;;  %vm349_vm3 = vcmask 253952   ;;  %vm347_vm4 = vcmask 261120  }
  0x32   : > { %451 = vmatmul.msk.bf16.vlgmr.msra.gmra.mxu0 %vm238_vm1, %v237_v9  ;;  %s806_s16 = smov (!%p221_p1, %s701_s16), 1 }
  0x33   : > { %453 = vmatmul.msk.bf16.vlgmr.msra.gmra.mxu1 %vm238_vm1, %v266_v13  ;;  %455 = vmatmul.msk.bf16.vlgmr.msra.gmra.mxu2 %vm238_vm1, %v293_v14  ;;  %s461_s17 = sshll.u32 %s806_s16, 4 }
  0x34   : > { %457 = vmatmul.msk.bf16.vlgmr.msra.gmra.mxu3 %vm238_vm1, %v320_v15  ;;  %s225_s5 = scalar_lea.vmem %s797_s3, %s461_s17 }
  0xaf   : > { %v255_v18 = vpop.f32.mrf.mxu0 }
  0xb0   : > { %v282_v19 = vpop.f32.mrf.mxu1  ;;  %v260_v20 = vrot.slane %v255_v18, 7 }
  0xb1   : > { %v287_v21 = vrot.slane %v282_v19, 7 }
  0xb2   : > { %v262_v22 = vadd.f32 %v260_v20, %v227_v16  ;;  %v263_v23 = vadd.f32 %v260_v20, %v228_v17 }
  0xb4   : > { %v289_v24 = vadd.f32 %v287_v21, %v262_v22  ;;  %v290_v25 = vadd.f32 %v287_v21, %v263_v23 }
  0xb6   : > { %v309_v26 = vpop.f32.mrf.mxu2 }
  0xb7   : > { %v336_v27 = vpop.f32.mrf.mxu3  ;;  %v314_v28 = vrot.slane %v309_v26, 7  ;;  %v257_v29 = vpop.f32.mrf.mxu0 }
  0xb8   : > { %v284_v30 = vpop.f32.mrf.mxu1  ;;  %v341_v33 = vrot.slane %v336_v27, 7 }
  0xb9   : > { %v316_v31 = vadd.f32 %v314_v28, %v289_v24  ;;  %v317_v32 = vadd.f32 %v314_v28, %v290_v25 }
  0xbb   : > { %v343_v34 = vadd.f32 %v341_v33, %v316_v31  ;;  %v344_v35 = vadd.f32 %v341_v33, %v317_v32 }
  0xbd   : > { %v346_v36 = vsel %vm345_vm2, %v227_v16, %v343_v34  ;;  %350 = vst.msk [vmem:[%s225_s5 + $0x8] sm:$0x1] %vm349_vm3, %v344_v35 }
  0xbe   : > { %348 = vst.msk [vmem:[%s225_s5] sm:$0xff] %vm347_vm4, %v346_v36  ;;  %v311_v37 = vpop.f32.mrf.mxu2 }
  0xbf   : > { %v338_v38 = vpop.f32.mrf.mxu3 }
  0xc0 PF: > { %p14_p4 = scmp.ge.s32.totalorder %s731_s6, 4   ;;  %s801_s12 = smov %s646_s13 }
  0xc1   : > { %s802_s13 = smov %s650_s14  ;;  %s803_s14 = smov %s740_s9 }
  0xc2   : > { %s804_s15 = smov %s731_s6  ;;  %16 = sbr.rel (!%p14_p4) target bundleno = 4 (0x4), region = 86 }
  0xc7   :  { %372 = vsyncpa [#allocation3], 1 }
  0xc8   :  { %374 = vsyncpa [#allocation3 + $0x1], 1 }
  0xc9   :  { %375 = vsyncpa [#allocation5], 1 }

</bundles_post_ra>
